<compile_context>
chip_gen: v7x
topology: tpu7x:2x2x1
jax: 0.10.0
libtpu: 0.0.40
codegen_flags: <defaults>
</compile_context>

<pallas_src>
import jax
import jax.numpy as jnp
import numpy as np
from jax.experimental import pallas as pl
from jax.experimental.pallas import tpu as pltpu

_INV_SQRT2 = 0.7071067811865476  # hoisted constant for exact (erf) GELU


def make_tcn_kernel(N, L, C_in, ch0, ch1, ch2):
    L2 = L - 2
    L3 = L - 4

    def tcn_kernel(x_ref, w1_ref, b1_ref, w2_ref, b2_ref, w3_ref, b3_ref, o_ref):
        # x_ref: (N*L, C_in) f32 -- batch folded into rows, channels on lanes.
        x = x_ref[...]

        # ---- layer 0: Conv1d(C_in, ch0, k=1) as C_in VPU broadcast-FMAs, init = bias
        h1 = jnp.broadcast_to(b1_ref[...], (N * L, ch0))          # (N*L, ch0) f32
        for c in range(C_in):
            h1 = h1 + x[:, c:c + 1] * w1_ref[c:c + 1, :]
        # exact (erf) GELU, matching torch.nn.GELU default, in f32
        h1 = 0.5 * h1 * (1.0 + jax.lax.erf(h1 * _INV_SQRT2))
        h1 = h1.astype(jnp.bfloat16)   # cast BEFORE slicing: halves shuffle bytes

        # ---- layer 1: Conv1d(ch0, ch1, k=3) valid -- 3 shifted matmuls, batch in M
        h2 = jnp.broadcast_to(b2_ref[...], (N * L2, ch1)).astype(jnp.float32)
        for k in range(3):
            rows = jnp.concatenate(
                [h1[n * L + k: n * L + k + L2, :] for n in range(N)], axis=0
            )                                                       # (N*L2, ch0) bf16
            h2 = h2 + jnp.dot(rows, w2_ref[k], preferred_element_type=jnp.float32)
        h2 = h2.astype(jnp.bfloat16)   # cast before layer-2 slices

        # ---- layer 2: Conv1d(ch1, ch2, k=3) valid -- 3 shifted matmuls, batch in M
        h3 = jnp.broadcast_to(b3_ref[...], (N * L3, ch2)).astype(jnp.float32)
        for k in range(3):
            rows = jnp.concatenate(
                [h2[n * L2 + k: n * L2 + k + L3, :] for n in range(N)], axis=0
            )                                                       # (N*L3, ch1) bf16
            h3 = h3 + jnp.dot(rows, w3_ref[k], preferred_element_type=jnp.float32)

        o_ref[...] = h3                # (N*L3, 256): lane-dense, sublane-aligned store

    return tcn_kernel


def tcn_forward(x_ncl, w1_oik, b1, w2_oik, b2, w3_oik, b3):
    """x_ncl: (N, C_in, L).  Weights in PyTorch Conv1d layout (out, in, K)."""
    N, C_in, L = x_ncl.shape
    ch0 = w1_oik.shape[0]
    ch1 = w2_oik.shape[0]
    ch2 = w3_oik.shape[0]
    L_out = L - 4
    L2 = L - 2

    # ---- host-side layout plumbing (free): row-major (N*L, C) activations,
    #      matmul-ready (K, I, O) weights, bf16 MXU operands.
    x_rows = jnp.transpose(x_ncl, (0, 2, 1)).reshape(N * L, C_in).astype(jnp.float32)
    w1_m = jnp.transpose(w1_oik.reshape(ch0, C_in), (1, 0)).astype(jnp.float32)   # (C_in, ch0)
    w2_m = jnp.transpose(w2_oik, (2, 1, 0)).astype(jnp.bfloat16)                  # (3, ch0, ch1)
    w3_m = jnp.transpose(w3_oik, (2, 1, 0)).astype(jnp.bfloat16)                  # (3, ch1, ch2)
    b1_m = b1.reshape(1, ch0).astype(jnp.float32)
    b2_m = b2.reshape(1, ch1).astype(jnp.float32)
    b3_m = b3.reshape(1, ch2).astype(jnp.float32)

    flops = (2 * N * L * C_in * ch0
             + 2 * N * L2 * 3 * ch0 * ch1
             + 2 * N * L_out * 3 * ch1 * ch2)
    bytes_accessed = (x_rows.size * 4 + w1_m.size * 4 + w2_m.size * 2 + w3_m.size * 2
                      + (ch0 + ch1 + ch2) * 4 + N * L_out * ch2 * 4)

    out_rows = pl.pallas_call(
        make_tcn_kernel(N, L, C_in, ch0, ch1, ch2),
        out_shape=jax.ShapeDtypeStruct((N * L_out, ch2), jnp.float32),
        grid_spec=pltpu.PrefetchScalarGridSpec(
            num_scalar_prefetch=0,
            grid=(1,),                                               # single step
            in_specs=[
                pl.BlockSpec((N * L, C_in), lambda i: (0, 0)),       # x rows
                pl.BlockSpec((C_in, ch0), lambda i: (0, 0)),         # w1 (I, O)
                pl.BlockSpec((1, ch0), lambda i: (0, 0)),            # b1
                pl.BlockSpec((3, ch0, ch1), lambda i: (0, 0, 0)),    # w2 (K, I, O)
                pl.BlockSpec((1, ch1), lambda i: (0, 0)),            # b2
                pl.BlockSpec((3, ch1, ch2), lambda i: (0, 0, 0)),    # w3 (K, I, O)
                pl.BlockSpec((1, ch2), lambda i: (0, 0)),            # b3
            ],
            out_specs=pl.BlockSpec((N * L_out, ch2), lambda i: (0, 0)),
        ),
        cost_estimate=pl.CostEstimate(
            flops=flops, transcendentals=N * L * ch0, bytes_accessed=bytes_accessed),
    )(x_rows, w1_m, b1_m, w2_m, b2_m, w3_m, b3_m)

    # (N*L_out, ch2) -> (N, ch2, L_out) -> PyTorch flatten(start_dim=1)   (host glue)
    out_nlc = out_rows.reshape(N, L_out, ch2)
    return jnp.transpose(out_nlc, (0, 2, 1)).reshape(N, -1)


# ---------------------------- reference / test ----------------------------

def _conv1d_valid(x_ncl, w_oik, b):
    out = jax.lax.conv_general_dilated(
        x_ncl, w_oik, window_strides=(1,), padding="VALID",
        dimension_numbers=("NCH", "OIH", "NCH"))
    return out + b[None, :, None]


if __name__ == "__main__":
    key = jax.random.PRNGKey(0)
    ks = jax.random.split(key, 8)

    # state_shape = (4, 16) -> input (N=2, C=4, L=16); ch = [64, 128, 256]
    N, C_in, L = 2, 4, 16
    ch = [64, 128, 256]

    x = jax.random.normal(ks[0], (N, C_in, L), jnp.float32)

    # deterministic synthetic parameters, PyTorch Conv1d layout (out, in, K)
    w1 = 0.1 * jax.random.normal(ks[1], (ch[0], C_in, 1), jnp.float32)
    b1 = 0.1 * jax.random.normal(ks[2], (ch[0],), jnp.float32)
    w2 = 0.05 * jax.random.normal(ks[3], (ch[1], ch[0], 3), jnp.float32)
    b2 = 0.1 * jax.random.normal(ks[4], (ch[1],), jnp.float32)
    w3 = 0.05 * jax.random.normal(ks[5], (ch[2], ch[1], 3), jnp.float32)
    b3 = 0.1 * jax.random.normal(ks[6], (ch[2],), jnp.float32)

    out = tcn_forward(x, w1, b1, w2, b2, w3, b3)
    out = jax.block_until_ready(out)

    # pure-JAX reference mirroring the kernel's bf16 MXU operands / f32 accumulation
    # (validates against the kernel's own quantization choice; pure-f32 PyTorch
    #  would differ by normal bf16 matmul error)
    def bf16_round(a):
        return a.astype(jnp.bfloat16).astype(jnp.float32)

    h = _conv1d_valid(x, w1, b1)                                     # layer 0 in f32
    h = 0.5 * h * (1.0 + jax.lax.erf(h * _INV_SQRT2))                # exact GELU
    h = _conv1d_valid(bf16_round(h), bf16_round(w2), b2)             # layer 1
    h = _conv1d_valid(bf16_round(h), bf16_round(w3), b3)             # layer 2
    ref = h.reshape(N, -1)

    assert out.shape == (N, ch[2] * (L - 4)), out.shape
    np.testing.assert_allclose(np.asarray(out), np.asarray(ref),
                               rtol=2e-3, atol=2e-3)
    print("KERNEL_OK")
</pallas_src>

<mosaic_0001>
module attributes {stable_mosaic.version = 11 : i64} {
  func.func @tcn_kernel(%arg0: i32, %arg1: memref<32x4xf32, #tpu.memory_space<vmem>>, %arg2: memref<4x64xf32, #tpu.memory_space<vmem>>, %arg3: memref<1x64xf32, #tpu.memory_space<vmem>>, %arg4: memref<3x64x128xbf16, #tpu.memory_space<vmem>>, %arg5: memref<1x128xf32, #tpu.memory_space<vmem>>, %arg6: memref<3x128x256xbf16, #tpu.memory_space<vmem>>, %arg7: memref<1x256xf32, #tpu.memory_space<vmem>>, %arg8: memref<24x256xf32, #tpu.memory_space<vmem>>) attributes {dimension_semantics = [#tpu.dimension_semantics<arbitrary>], iteration_bounds = array<i64: 1>, scalar_prefetch = 0 : i64, scratch_operands = 0 : i64, tpu.core_type = #tpu.core_type<tc>, window_params = [{pipeline_mode = #tpu.pipeline_mode<synchronous>, transform_indices = @transform_0, window_bounds = array<i64: 32, 4>}, {pipeline_mode = #tpu.pipeline_mode<synchronous>, transform_indices = @transform_1, window_bounds = array<i64: 4, 64>}, {pipeline_mode = #tpu.pipeline_mode<synchronous>, transform_indices = @transform_2, window_bounds = array<i64: 1, 64>}, {pipeline_mode = #tpu.pipeline_mode<synchronous>, transform_indices = @transform_3, window_bounds = array<i64: 3, 64, 128>}, {pipeline_mode = #tpu.pipeline_mode<synchronous>, transform_indices = @transform_4, window_bounds = array<i64: 1, 128>}, {pipeline_mode = #tpu.pipeline_mode<synchronous>, transform_indices = @transform_5, window_bounds = array<i64: 3, 128, 256>}, {pipeline_mode = #tpu.pipeline_mode<synchronous>, transform_indices = @transform_6, window_bounds = array<i64: 1, 256>}, {pipeline_mode = #tpu.pipeline_mode<synchronous>, transform_indices = @transform_7, window_bounds = array<i64: 24, 256>}]} {
    %c0 = arith.constant 0 : index
    %c0_0 = arith.constant 0 : index
    %0 = vector.load %arg1[%c0, %c0_0] : memref<32x4xf32, #tpu.memory_space<vmem>>, vector<32x4xf32>
    %c0_1 = arith.constant 0 : index
    %c0_2 = arith.constant 0 : index
    %1 = vector.load %arg3[%c0_1, %c0_2] : memref<1x64xf32, #tpu.memory_space<vmem>>, vector<1x64xf32>
    %2 = vector.shape_cast %1 : vector<1x64xf32> to vector<1x64xf32>
    %3 = vector.broadcast %2 : vector<1x64xf32> to vector<32x64xf32>
    %4 = vector.extract_strided_slice %0 {offsets = [0, 0], sizes = [32, 1], strides = [1, 1]} : vector<32x4xf32> to vector<32x1xf32>
    %c0_3 = arith.constant 0 : index
    %c0_4 = arith.constant 0 : index
    %5 = vector.load %arg2[%c0_3, %c0_4] : memref<4x64xf32, #tpu.memory_space<vmem>>, vector<1x64xf32>
    %6 = vector.broadcast %4 : vector<32x1xf32> to vector<32x64xf32>
    %7 = vector.broadcast %5 : vector<1x64xf32> to vector<32x64xf32>
    %8 = arith.mulf %6, %7 : vector<32x64xf32>
    %9 = arith.addf %3, %8 : vector<32x64xf32>
    %10 = vector.extract_strided_slice %0 {offsets = [0, 1], sizes = [32, 1], strides = [1, 1]} : vector<32x4xf32> to vector<32x1xf32>
    %c1 = arith.constant 1 : index
    %c0_5 = arith.constant 0 : index
    %11 = vector.load %arg2[%c1, %c0_5] : memref<4x64xf32, #tpu.memory_space<vmem>>, vector<1x64xf32>
    %12 = vector.broadcast %10 : vector<32x1xf32> to vector<32x64xf32>
    %13 = vector.broadcast %11 : vector<1x64xf32> to vector<32x64xf32>
    %14 = arith.mulf %12, %13 : vector<32x64xf32>
    %15 = arith.addf %9, %14 : vector<32x64xf32>
    %16 = vector.extract_strided_slice %0 {offsets = [0, 2], sizes = [32, 1], strides = [1, 1]} : vector<32x4xf32> to vector<32x1xf32>
    %c2 = arith.constant 2 : index
    %c0_6 = arith.constant 0 : index
    %17 = vector.load %arg2[%c2, %c0_6] : memref<4x64xf32, #tpu.memory_space<vmem>>, vector<1x64xf32>
    %18 = vector.broadcast %16 : vector<32x1xf32> to vector<32x64xf32>
    %19 = vector.broadcast %17 : vector<1x64xf32> to vector<32x64xf32>
    %20 = arith.mulf %18, %19 : vector<32x64xf32>
    %21 = arith.addf %15, %20 : vector<32x64xf32>
    %22 = vector.extract_strided_slice %0 {offsets = [0, 3], sizes = [32, 1], strides = [1, 1]} : vector<32x4xf32> to vector<32x1xf32>
    %c3 = arith.constant 3 : index
    %c0_7 = arith.constant 0 : index
    %23 = vector.load %arg2[%c3, %c0_7] : memref<4x64xf32, #tpu.memory_space<vmem>>, vector<1x64xf32>
    %24 = vector.broadcast %22 : vector<32x1xf32> to vector<32x64xf32>
    %25 = vector.broadcast %23 : vector<1x64xf32> to vector<32x64xf32>
    %26 = arith.mulf %24, %25 : vector<32x64xf32>
    %27 = arith.addf %21, %26 : vector<32x64xf32>
    %cst = arith.constant 5.000000e-01 : f32
    %28 = vector.broadcast %cst : f32 to vector<32x64xf32>
    %29 = arith.mulf %28, %27 : vector<32x64xf32>
    %cst_8 = arith.constant 0.707106769 : f32
    %30 = vector.broadcast %cst_8 : f32 to vector<32x64xf32>
    %31 = arith.mulf %27, %30 : vector<32x64xf32>
    %32 = math.erf %31 : vector<32x64xf32>
    %cst_9 = arith.constant 1.000000e+00 : f32
    %33 = vector.broadcast %cst_9 : f32 to vector<32x64xf32>
    %34 = arith.addf %33, %32 : vector<32x64xf32>
    %35 = arith.mulf %29, %34 : vector<32x64xf32>
    %36 = arith.truncf %35 : vector<32x64xf32> to vector<32x64xbf16>
    %c0_10 = arith.constant 0 : index
    %c0_11 = arith.constant 0 : index
    %37 = vector.load %arg5[%c0_10, %c0_11] : memref<1x128xf32, #tpu.memory_space<vmem>>, vector<1x128xf32>
    %38 = vector.shape_cast %37 : vector<1x128xf32> to vector<1x128xf32>
    %39 = vector.broadcast %38 : vector<1x128xf32> to vector<28x128xf32>
    %40 = vector.extract_strided_slice %36 {offsets = [0, 0], sizes = [14, 64], strides = [1, 1]} : vector<32x64xbf16> to vector<14x64xbf16>
    %41 = vector.extract_strided_slice %36 {offsets = [16, 0], sizes = [14, 64], strides = [1, 1]} : vector<32x64xbf16> to vector<14x64xbf16>
    %42 = tpu.concatenate %40, %41 in 0 : vector<14x64xbf16>, vector<14x64xbf16> -> vector<28x64xbf16>
    %c0_12 = arith.constant 0 : index
    %c0_13 = arith.constant 0 : index
    %c0_14 = arith.constant 0 : index
    %43 = vector.load %arg4[%c0_12, %c0_13, %c0_14] : memref<3x64x128xbf16, #tpu.memory_space<vmem>>, vector<1x64x128xbf16>
    %44 = vector.shape_cast %43 : vector<1x64x128xbf16> to vector<64x128xbf16>
    %cst_15 = arith.constant dense<0.000000e+00> : vector<28x128xf32>
    %45 = tpu.matmul %42, %44, %cst_15 {dimension_numbers = #tpu.dot_dimension_numbers<[1], [0], [0], [1], [0, 0, 1, 1], [], []>} : vector<28x64xbf16>, vector<64x128xbf16>, vector<28x128xf32> -> vector<28x128xf32>
    %46 = arith.addf %39, %45 : vector<28x128xf32>
    %47 = vector.extract_strided_slice %36 {offsets = [1, 0], sizes = [14, 64], strides = [1, 1]} : vector<32x64xbf16> to vector<14x64xbf16>
    %48 = vector.extract_strided_slice %36 {offsets = [17, 0], sizes = [14, 64], strides = [1, 1]} : vector<32x64xbf16> to vector<14x64xbf16>
    %49 = tpu.concatenate %47, %48 in 0 : vector<14x64xbf16>, vector<14x64xbf16> -> vector<28x64xbf16>
    %c1_16 = arith.constant 1 : index
    %c0_17 = arith.constant 0 : index
    %c0_18 = arith.constant 0 : index
    %50 = vector.load %arg4[%c1_16, %c0_17, %c0_18] : memref<3x64x128xbf16, #tpu.memory_space<vmem>>, vector<1x64x128xbf16>
    %51 = vector.shape_cast %50 : vector<1x64x128xbf16> to vector<64x128xbf16>
    %cst_19 = arith.constant dense<0.000000e+00> : vector<28x128xf32>
    %52 = tpu.matmul %49, %51, %cst_19 {dimension_numbers = #tpu.dot_dimension_numbers<[1], [0], [0], [1], [0, 0, 1, 1], [], []>} : vector<28x64xbf16>, vector<64x128xbf16>, vector<28x128xf32> -> vector<28x128xf32>
    %53 = arith.addf %46, %52 : vector<28x128xf32>
    %54 = vector.extract_strided_slice %36 {offsets = [2, 0], sizes = [14, 64], strides = [1, 1]} : vector<32x64xbf16> to vector<14x64xbf16>
    %55 = vector.extract_strided_slice %36 {offsets = [18, 0], sizes = [14, 64], strides = [1, 1]} : vector<32x64xbf16> to vector<14x64xbf16>
    %56 = tpu.concatenate %54, %55 in 0 : vector<14x64xbf16>, vector<14x64xbf16> -> vector<28x64xbf16>
    %c2_20 = arith.constant 2 : index
    %c0_21 = arith.constant 0 : index
    %c0_22 = arith.constant 0 : index
    %57 = vector.load %arg4[%c2_20, %c0_21, %c0_22] : memref<3x64x128xbf16, #tpu.memory_space<vmem>>, vector<1x64x128xbf16>
    %58 = vector.shape_cast %57 : vector<1x64x128xbf16> to vector<64x128xbf16>
    %cst_23 = arith.constant dense<0.000000e+00> : vector<28x128xf32>
    %59 = tpu.matmul %56, %58, %cst_23 {dimension_numbers = #tpu.dot_dimension_numbers<[1], [0], [0], [1], [0, 0, 1, 1], [], []>} : vector<28x64xbf16>, vector<64x128xbf16>, vector<28x128xf32> -> vector<28x128xf32>
    %60 = arith.addf %53, %59 : vector<28x128xf32>
    %61 = arith.truncf %60 : vector<28x128xf32> to vector<28x128xbf16>
    %c0_24 = arith.constant 0 : index
    %c0_25 = arith.constant 0 : index
    %62 = vector.load %arg7[%c0_24, %c0_25] : memref<1x256xf32, #tpu.memory_space<vmem>>, vector<1x256xf32>
    %63 = vector.shape_cast %62 : vector<1x256xf32> to vector<1x256xf32>
    %64 = vector.broadcast %63 : vector<1x256xf32> to vector<24x256xf32>
    %65 = vector.extract_strided_slice %61 {offsets = [0, 0], sizes = [12, 128], strides = [1, 1]} : vector<28x128xbf16> to vector<12x128xbf16>
    %66 = vector.extract_strided_slice %61 {offsets = [14, 0], sizes = [12, 128], strides = [1, 1]} : vector<28x128xbf16> to vector<12x128xbf16>
    %67 = tpu.concatenate %65, %66 in 0 : vector<12x128xbf16>, vector<12x128xbf16> -> vector<24x128xbf16>
    %c0_26 = arith.constant 0 : index
    %c0_27 = arith.constant 0 : index
    %c0_28 = arith.constant 0 : index
    %68 = vector.load %arg6[%c0_26, %c0_27, %c0_28] : memref<3x128x256xbf16, #tpu.memory_space<vmem>>, vector<1x128x256xbf16>
    %69 = vector.shape_cast %68 : vector<1x128x256xbf16> to vector<128x256xbf16>
    %cst_29 = arith.constant dense<0.000000e+00> : vector<24x256xf32>
    %70 = tpu.matmul %67, %69, %cst_29 {dimension_numbers = #tpu.dot_dimension_numbers<[1], [0], [0], [1], [0, 0, 1, 1], [], []>} : vector<24x128xbf16>, vector<128x256xbf16>, vector<24x256xf32> -> vector<24x256xf32>
    %71 = arith.addf %64, %70 : vector<24x256xf32>
    %72 = vector.extract_strided_slice %61 {offsets = [1, 0], sizes = [12, 128], strides = [1, 1]} : vector<28x128xbf16> to vector<12x128xbf16>
    %73 = vector.extract_strided_slice %61 {offsets = [15, 0], sizes = [12, 128], strides = [1, 1]} : vector<28x128xbf16> to vector<12x128xbf16>
    %74 = tpu.concatenate %72, %73 in 0 : vector<12x128xbf16>, vector<12x128xbf16> -> vector<24x128xbf16>
    %c1_30 = arith.constant 1 : index
    %c0_31 = arith.constant 0 : index
    %c0_32 = arith.constant 0 : index
    %75 = vector.load %arg6[%c1_30, %c0_31, %c0_32] : memref<3x128x256xbf16, #tpu.memory_space<vmem>>, vector<1x128x256xbf16>
    %76 = vector.shape_cast %75 : vector<1x128x256xbf16> to vector<128x256xbf16>
    %cst_33 = arith.constant dense<0.000000e+00> : vector<24x256xf32>
    %77 = tpu.matmul %74, %76, %cst_33 {dimension_numbers = #tpu.dot_dimension_numbers<[1], [0], [0], [1], [0, 0, 1, 1], [], []>} : vector<24x128xbf16>, vector<128x256xbf16>, vector<24x256xf32> -> vector<24x256xf32>
    %78 = arith.addf %71, %77 : vector<24x256xf32>
    %79 = vector.extract_strided_slice %61 {offsets = [2, 0], sizes = [12, 128], strides = [1, 1]} : vector<28x128xbf16> to vector<12x128xbf16>
    %80 = vector.extract_strided_slice %61 {offsets = [16, 0], sizes = [12, 128], strides = [1, 1]} : vector<28x128xbf16> to vector<12x128xbf16>
    %81 = tpu.concatenate %79, %80 in 0 : vector<12x128xbf16>, vector<12x128xbf16> -> vector<24x128xbf16>
    %c2_34 = arith.constant 2 : index
    %c0_35 = arith.constant 0 : index
    %c0_36 = arith.constant 0 : index
    %82 = vector.load %arg6[%c2_34, %c0_35, %c0_36] : memref<3x128x256xbf16, #tpu.memory_space<vmem>>, vector<1x128x256xbf16>
    %83 = vector.shape_cast %82 : vector<1x128x256xbf16> to vector<128x256xbf16>
    %cst_37 = arith.constant dense<0.000000e+00> : vector<24x256xf32>
    %84 = tpu.matmul %81, %83, %cst_37 {dimension_numbers = #tpu.dot_dimension_numbers<[1], [0], [0], [1], [0, 0, 1, 1], [], []>} : vector<24x128xbf16>, vector<128x256xbf16>, vector<24x256xf32> -> vector<24x256xf32>
    %85 = arith.addf %78, %84 : vector<24x256xf32>
    %c0_38 = arith.constant 0 : index
    %c0_39 = arith.constant 0 : index
    %86 = vector.load %arg8[%c0_38, %c0_39] : memref<24x256xf32, #tpu.memory_space<vmem>>, vector<24x256xf32>
    tpu.vector_store %arg8[%c0_38, %c0_39], %85 {strides = array<i32>} : memref<24x256xf32, #tpu.memory_space<vmem>>, vector<24x256xf32>,
    return
  }
  func.func @transform_0(%arg0: i32) -> (i32, i32) {
    %c0_i32 = arith.constant 0 : i32
    %c0_i32_0 = arith.constant 0 : i32
    %c0_i32_1 = arith.constant 0 : i32
    return %c0_i32, %c0_i32_0 : i32, i32
  }
  func.func @transform_1(%arg0: i32) -> (i32, i32) {
    %c0_i32 = arith.constant 0 : i32
    %c0_i32_0 = arith.constant 0 : i32
    %c0_i32_1 = arith.constant 0 : i32
    return %c0_i32, %c0_i32_0 : i32, i32
  }
  func.func @transform_2(%arg0: i32) -> (i32, i32) {
    %c0_i32 = arith.constant 0 : i32
    %c0_i32_0 = arith.constant 0 : i32
    %c0_i32_1 = arith.constant 0 : i32
    return %c0_i32, %c0_i32_0 : i32, i32
  }
  func.func @transform_3(%arg0: i32) -> (i32, i32, i32) {
    %c0_i32 = arith.constant 0 : i32
    %c0_i32_0 = arith.constant 0 : i32
    %c0_i32_1 = arith.constant 0 : i32
    %c0_i32_2 = arith.constant 0 : i32
    return %c0_i32, %c0_i32_0, %c0_i32_1 : i32, i32, i32
  }
  func.func @transform_4(%arg0: i32) -> (i32, i32) {
    %c0_i32 = arith.constant 0 : i32
    %c0_i32_0 = arith.constant 0 : i32
    %c0_i32_1 = arith.constant 0 : i32
    return %c0_i32, %c0_i32_0 : i32, i32
  }
  func.func @transform_5(%arg0: i32) -> (i32, i32, i32) {
    %c0_i32 = arith.constant 0 : i32
    %c0_i32_0 = arith.constant 0 : i32
    %c0_i32_1 = arith.constant 0 : i32
    %c0_i32_2 = arith.constant 0 : i32
    return %c0_i32, %c0_i32_0, %c0_i32_1 : i32, i32, i32
  }
  func.func @transform_6(%arg0: i32) -> (i32, i32) {
    %c0_i32 = arith.constant 0 : i32
    %c0_i32_0 = arith.constant 0 : i32
    %c0_i32_1 = arith.constant 0 : i32
    return %c0_i32, %c0_i32_0 : i32, i32
  }
  func.func @transform_7(%arg0: i32) -> (i32, i32) {
    %c0_i32 = arith.constant 0 : i32
    %c0_i32_0 = arith.constant 0 : i32
    %c0_i32_1 = arith.constant 0 : i32
    return %c0_i32, %c0_i32_0 : i32, i32
  }
}

</mosaic_0001>

<bundles_post_ra>
// kernel: tpu_custom_call.1
= control target key start
LH: loop header
LB: loop body
LE: loop exit
PB: predicated region body
PF: predicated region fallthrough
CT: control target
= control target key end

     0   :  { %12 = vsyncpa [#allocation3], 0  ;;  %s1544_s0 = inlined_call_operand.vmem [shape: f32[32,4], index: 0, kind: input, shape index: {}]   ;;  %s1545_s1 = inlined_call_operand.vmem [shape: f32[4,64], index: 1, kind: input, shape index: {}]   ;;  %s1546_s2 = inlined_call_operand.vmem [shape: f32[1,64], index: 2, kind: input, shape index: {}]   ;;  %s1547_s3 = inlined_call_operand.hbm [shape: bf16[3,64,128], index: 3, kind: input, shape index: {}]   ;;  %s1548_s4 = inlined_call_operand.vmem [shape: f32[1,128], index: 4, kind: input, shape index: {}]   ;;  %s1549_s5 = inlined_call_operand.hbm [shape: bf16[3,128,256], index: 5, kind: input, shape index: {}]   ;;  %s1550_s6 = inlined_call_operand.vmem [shape: f32[1,256], index: 6, kind: input, shape index: {}]   ;;  %s1551_s7 = inlined_call_operand.hbm [shape: f32[24,256], index: 7, kind: output, shape index: {}]  }
   0x1   :  { %13 = vsyncpa [#allocation6], 0 }
   0x2   :  { %14 = vsyncpa [#allocation4], 0  ;;  %s1397_s24 = smov [#allocation2]   ;;  %s1325_s28 = scalar_lea.hbm %s1547_s3, 1536 }
   0x3   :  { %s26_s25 = sshll.u32 %s1397_s24, 4  ;;  %p1326_p0 = scmp.ne.s32.totalorder %s1547_s3, %s1325_s28  ;;  %s27_s25 = int_to_ptr.vmem [resolvable:$true] %s26_s25 }
   0x4   :  { %p1329_p1 = scmp.lt.u32.totalorder %s1325_s28, %s1547_s3 }
   0x6   :  { %p1331_p2 = pnand %p1329_p1, %p1326_p0 }
   0x8   :  { %1334 = shalt.err (!%p1331_p2)
}
   0x9   :  { %s1335_s10 = scalar_lea.vmem %s27_s25, 1536  ;;  %p1340_p4 = scmp.lt.s32.totalorder %s27_s25, %s27_s25 }
   0xa   :  { %p1336_p3 = scmp.ne.s32.totalorder %s27_s25, %s1335_s10  ;;  %p1341_p5 = scmp.lt.s32.totalorder %s1335_s10, %s1335_s10 }
   0xc   :  { %p1342_p6 = por %p1341_p5, %p1340_p4 }
   0xe   :  { %p1343_p7 = pnand %p1342_p6, %p1336_p3 }
  0x10   :  { %1346 = shalt.err (!%p1343_p7)
}
  0x11   :  { %s1398_s11 = smov 64   ;;  %s1399_s12 = smov 4  }
  0x12   :  { %32 = dma.hbm_to_vmem [thread:$0]  %s1547_s3, 1536, %s27_s25, [#allocation3], %s1398_s11, %s1398_s11, %s1399_s12  }
  0x13   :  { %s1400_s15 = smov [#allocation5]   ;;  %s1347_s19 = scalar_lea.hbm %s1549_s5, 6144 }
  0x14   :  { %s40_s16 = sshll.u32 %s1400_s15, 4  ;;  %p1348_p8 = scmp.ne.s32.totalorder %s1549_s5, %s1347_s19  ;;  %s41_s16 = int_to_ptr.vmem [resolvable:$true] %s40_s16 }
  0x15   :  { %p1351_p9 = scmp.lt.u32.totalorder %s1347_s19, %s1549_s5 }
  0x17   :  { %p1353_p10 = pnand %p1351_p9, %p1348_p8 }
  0x19   :  { %1356 = shalt.err (!%p1353_p10)
}
  0x1a   :  { %s1357_s24 = scalar_lea.vmem %s41_s16, 6144  ;;  %p1362_p12 = scmp.lt.s32.totalorder %s41_s16, %s41_s16 }
  0x1b   :  { %p1358_p11 = scmp.ne.s32.totalorder %s41_s16, %s1357_s24  ;;  %p1363_p13 = scmp.lt.s32.totalorder %s1357_s24, %s1357_s24 }
  0x1d   :  { %p1364_p0 = por %p1363_p13, %p1362_p12 }
  0x1f   :  { %p1365_p1 = pnand %p1364_p0, %p1358_p11 }
  0x21   :  { %1368 = shalt.err (!%p1365_p1)
}
  0x22   :  { %s1401_s3 = smov 128   ;;  %s1402_s25 = smov 8  }
  0x23   :  { %46 = dma.hbm_to_vmem [thread:$0]  %s1549_s5, 6144, %s41_s16, [#allocation6], %s1401_s3, %s1401_s3, %s1402_s25  }
  0x24   :  { %1391 = dma.done.wait [#allocation3], 1536  }
  0x25   :  { %1392 = vsyncadd [#allocation3], 4294965760 }
  0x26   :  { %1393 = dma.done.wait [#allocation6], 6144  }
  0x27   :  { %1394 = vsyncadd [#allocation6], 4294961152  ;;  %v1403_v0 = vmov 0   ;;  %v58_v1 = vld [vmem:[%s1544_s0 + $0x10] sm:$0xff]  ;;  %v56_v2 = vld [vmem:[%s1544_s0] sm:$0xff]  ;;  %v1404_v5 = vmov 1  }
  0x28   :  { %1226 = vset.pattern.permute.xlu1 %v1403_v0  ;;  %1225 = vset.pattern.permute.xlu0 %v1403_v0  ;;  %v59_v3 = vld [vmem:[%s1544_s0 + $0x18] sm:$0xff]  ;;  %v57_v4 = vld [vmem:[%s1544_s0 + $0x8] sm:$0xff]  ;;  %v1405_v6 = vmov 2   ;;  %v1406_v7 = vmov 3   ;;  %v1233_v8 = vld [vmem:[#allocation2] sm:$0xff]   ;;  %vm218_vm0 = vcmask 1046528  }
  0x29   :  { %845 = vmatprep.mubr.bf16.mxu1 %v1403_v0  ;;  %80 = vperm.xlu0 %1225, %v58_v1   ;;  %v1234_v9 = vld [vmem:[#allocation2 + $0x8] sm:$0xff]   ;;  %v1235_v10 = vld [vmem:[#allocation2 + $0x10] sm:$0xff]   ;;  %v1236_v11 = vld [vmem:[#allocation2 + $0x18] sm:$0xff]   ;;  %vm254_vm1 = vcmask 523264   ;;  %vm536_vm2 = vcmask 1045504  }
  0x2a   :  { %70 = vperm.xlu1 %1226, %v56_v2   ;;  %1144 = vmatprep.subr.bf16.mxu0 %v1233_v8  ;;  %v1489_v12 = vld [vmem:[#allocation2 + $0x20] sm:$0xff]   ;;  %v1254_v15 = vld [vmem:[#allocation5 + $0x94] ss:$8 sps:$4 sm:$0xff]   ;;  %v1256_v16 = vld [vmem:[#allocation5 + $0x90] ss:$8 sps:$4 sm:$0xff]  }
  0x2b   :  { %1145 = vmatpush3.bf16.msra.mxu0 %v1233_v8  ;;  %v1248_v13 = vld [vmem:[#allocation5 + $0x84] ss:$8 sps:$4 sm:$0xff]   ;;  %v1250_v14 = vld [vmem:[#allocation5 + $0x80] ss:$8 sps:$4 sm:$0xff]   ;;  %v1266_v19 = vld [vmem:[#allocation5 + $0xb4] ss:$8 sps:$4 sm:$0xff]  }
  0x2c   :  { %1146 = vmatprep.subr.bf16.mxu0 %v1234_v9  ;;  %813 = vmatprep.subr.bf16.mxu1 %v1248_v13  ;;  %v1260_v17 = vld [vmem:[#allocation5 + $0xa4] ss:$8 sps:$4 sm:$0xff]   ;;  %v1262_v18 = vld [vmem:[#allocation5 + $0xa0] ss:$8 sps:$4 sm:$0xff]   ;;  %v1268_v20 = vld [vmem:[#allocation5 + $0xb0] ss:$8 sps:$4 sm:$0xff]  }
  0x2d   :  { %85 = vperm.xlu0 %1225, %v59_v3   ;;  %814 = vmatpush1.bf16.msra.mxu1 %v1250_v14  ;;  %v1272_v21 = vld [vmem:[#allocation5 + $0xc4] ss:$8 sps:$4 sm:$0xff]   ;;  %v1274_v22 = vld [vmem:[#allocation5 + $0xc0] ss:$8 sps:$4 sm:$0xff]   ;;  %vm700_vm3 = vsmask.f32 6400 }
  0x2e   :  { %75 = vperm.xlu1 %1226, %v57_v4   ;;  %815 = vmatprep.subr.bf16.mxu1 %v1254_v15  ;;  %v1055_v29 = vld [vmem:[%s1545_s1] ss:$0 sm:$0xff]  ;;  %v1056_v33 = vld [vmem:[%s1545_s1 + $0x1] ss:$0 sm:$0xff]  ;;  %v1057_v35 = vld [vmem:[%s1545_s1 + $0x2] ss:$0 sm:$0xff] }
  0x2f   :  { %1147 = vmatpush3.bf16.msra.mxu0 %v1234_v9  ;;  %v1054_v34 = vld [vmem:[%s1546_s2] ss:$0 sm:$0xff]  ;;  %v1058_v42 = vld [vmem:[%s1545_s1 + $0x3] ss:$0 sm:$0xff] }
  0x30   :  { %1148 = vmatprep.subr.bf16.mxu0 %v1235_v10 }
  0x31   :  { %1227 = vset.pattern.permute.xlu0 %v1404_v5  ;;  %816 = vmatpush1.bf16.msra.mxu1 %v1256_v16 }
  0x32   :  { %1228 = vset.pattern.permute.xlu1 %v1404_v5  ;;  %110 = vperm.xlu0 %1227, %v58_v1  }
  0x33   :  { %114 = vperm.xlu1 %1228, %v59_v3   ;;  %1149 = vmatpush3.bf16.msra.mxu0 %v1235_v10 }
  0x34   :  { %1150 = vmatprep.subr.bf16.mxu0 %v1236_v11  ;;  %817 = vmatprep.subr.bf16.mxu1 %v1260_v17 }
  0x35   :  { %818 = vmatpush1.bf16.msra.mxu1 %v1262_v18 }
  0x36   :  { %106 = vperm.xlu0 %1227, %v57_v4   ;;  %819 = vmatprep.subr.bf16.mxu1 %v1266_v19 }
  0x37   :  { %102 = vperm.xlu1 %1228, %v56_v2   ;;  %1151 = vmatpush3.bf16.msra.mxu0 %v1236_v11 }
  0x38   :  { %1156 = vmatprep.subr.bf16.mxu0 %v1489_v12 }
  0x39   :  { %820 = vmatpush1.bf16.msra.mxu1 %v1268_v20 }
  0x3a   :  { %1230 = vset.pattern.permute.xlu0 %v1405_v6  ;;  %821 = vmatprep.subr.bf16.mxu1 %v1272_v21 }
  0x3b   :  { %1229 = vset.pattern.permute.xlu1 %v1405_v6  ;;  %143 = vperm.xlu0 %1230, %v59_v3  }
  0x3c   :  { %139 = vperm.xlu1 %1229, %v58_v1  }
  0x3d   :  { %822 = vmatpush1.bf16.msra.mxu1 %v1274_v22 }
  0x3f   :  { %1231 = vset.pattern.permute.xlu0 %v1406_v7 }
  0x40   :  { %131 = vperm.xlu1 %1229, %v56_v2   ;;  %168 = vperm.xlu0 %1231, %v58_v1  }
  0x44   :  { %135 = vperm.xlu1 %1229, %v57_v4   ;;  %164 = vperm.xlu0 %1231, %v57_v4  }
  0x48   :  { %1232 = vset.pattern.permute.xlu1 %v1406_v7 }
  0x49   :  { %172 = vperm.xlu1 %1232, %v59_v3  }
  0x4d   :  { %160 = vperm.xlu1 %1232, %v56_v2  }
  0xa8   :  { %v81_v24 = vpop.permute.xlu0 %80 }
  0xa9   :  { %v71_v23 = vpop.permute.xlu1 %70  ;;  %v94_v32 = vmul.f32 %v1055_v29, %v81_v24 }
  0xaa   :  { %v92_v58 = vmul.f32 %v1055_v29, %v71_v23 }
  0xab   :  { %v98_v36 = vadd.f32 %v1054_v34, %v94_v32 }
  0xac   :  { %v86_v26 = vpop.permute.xlu0 %85  ;;  %v96_v4 = vadd.f32 %v1054_v34, %v92_v58  ;;  %v1245_v58 = vld [vmem:[#allocation5] ss:$8 sps:$4 sm:$0xff]  }
  0xad   :  { %v76_v25 = vpop.permute.xlu1 %75  ;;  %v95_v43 = vmul.f32 %v1055_v29, %v86_v26 }
  0xae   :  { %v93_v41 = vmul.f32 %v1055_v29, %v76_v25 }
  0xaf   :  { %v99_v51 = vadd.f32 %v1054_v34, %v95_v43 }
  0xb0   :  { %v97_v50 = vadd.f32 %v1054_v34, %v93_v41 }
  0xb1   :  { %v111_v27 = vpop.permute.xlu0 %110 }
  0xb2   :  { %v115_v28 = vpop.permute.xlu1 %114  ;;  %v123_v37 = vmul.f32 %v1056_v33, %v111_v27 }
  0xb3   :  { %v124_v52 = vmul.f32 %v1056_v33, %v115_v28 }
  0xb4   :  { %v127_v44 = vadd.f32 %v123_v37, %v98_v36 }
  0xb5   :  { %v107_v30 = vpop.permute.xlu0 %106  ;;  %v128_v62 = vadd.f32 %v124_v52, %v99_v51  ;;  %v1241_v51 = vld [vmem:[#allocation2 + $0x40] sm:$0xff]  }
  0xb6   :  { %v103_v31 = vpop.permute.xlu1 %102  ;;  %v122_v46 = vmul.f32 %v1056_v33, %v107_v30 }
  0xb7   :  { %v121_v63 = vmul.f32 %v1056_v33, %v103_v31 }
  0xb8   :  { %v126_v55 = vadd.f32 %v122_v46, %v97_v50  ;;  %v1240_v50 = vld [vmem:[#allocation2 + $0x38] sm:$0xff]  }
  0xb9   :  { %v125_v9 = vadd.f32 %v121_v63, %v96_v4  ;;  %v1265_v63 = vld [vmem:[#allocation5 + $0x34] ss:$8 sps:$4 sm:$0xff]  }
  0xba   :  { %v144_v38 = vpop.permute.xlu0 %143  ;;  %v1277_v4 = vld [vmem:[#allocation5 + $0x54] ss:$8 sps:$4 sm:$0xff]  }
  0xbb   :  { %v140_v39 = vpop.permute.xlu1 %139  ;;  %v153_v59 = vmul.f32 %v1057_v35, %v144_v38 }
  0xbc   :  { %v152_v40 = vmul.f32 %v1057_v35, %v140_v39 }
  0xbd   :  { %v157_v5 = vadd.f32 %v153_v59, %v128_v62  ;;  %v1253_v59 = vld [vmem:[#allocation5 + $0x14] ss:$8 sps:$4 sm:$0xff]   ;;  %v1257_v62 = vld [vmem:[#allocation5 + $0x20] ss:$8 sps:$4 sm:$0xff]  }
  0xbe   :  { %v156_v48 = vadd.f32 %v152_v40, %v127_v44  ;;  %v1238_v40 = vld [vmem:[#allocation2 + $0x28] sm:$0xff]  }
  0xbf   :  { %v132_v45 = vpop.permute.xlu1 %131  ;;  %v169_v47 = vpop.permute.xlu0 %168 }
  0xc0   :  { %v181_v49 = vmul.f32 %v1058_v42, %v169_v47  ;;  %v150_v6 = vmul.f32 %v1057_v35, %v132_v45 }
  0xc2   :  { %v185_v53 = vadd.f32 %v181_v49, %v156_v48  ;;  %v154_v13 = vadd.f32 %v150_v6, %v125_v9  ;;  %v1239_v48 = vld [vmem:[#allocation2 + $0x30] sm:$0xff]   ;;  %v1281_v9 = vld [vmem:[#allocation5 + $0x60] ss:$8 sps:$4 sm:$0xff]  }
  0xc3   :  { %v136_v54 = vpop.permute.xlu1 %135  ;;  %v165_v57 = vpop.permute.xlu0 %164  ;;  %v1278_v6 = vld [vmem:[#allocation5 + $0xd4] ss:$8 sps:$4 sm:$0xff]  }
  0xc4   :  { %v151_v56 = vmul.f32 %v1057_v35, %v136_v54  ;;  %v180_v60 = vmul.f32 %v1058_v42, %v165_v57  ;;  %v193_v1 = vmul.f32 0.70710677, %v185_v53  ;;  %v189_v22 = vmul.f32 0.5, %v185_v53  ;;  %v1242_v54 = vld [vmem:[#allocation2 + $0x48] sm:$0xff]   ;;  %823 = vmatprep.subr.bf16.mxu1 %v1278_v6 }
  0xc5   :  { %v1247_v57 = vld [vmem:[#allocation5 + $0x4] ss:$8 sps:$4 sm:$0xff]   ;;  %v519_v6 = vlaneseq }
  0xc6   :  { %v155_v61 = vadd.f32 %v151_v56, %v126_v55  ;;  %1317 = verf.f32 %v193_v1  ;;  %v1243_v55 = vld [vmem:[#allocation2 + $0x50] sm:$0xff]   ;;  %v1244_v56 = vld [vmem:[#allocation2 + $0x58] sm:$0xff]  }
  0xc7   :  { %v1263_v1 = vld [vmem:[#allocation5 + $0x30] ss:$8 sps:$4 sm:$0xff]  }
  0xc8   :  { %v184_v2 = vadd.f32 %v180_v60, %v155_v61  ;;  %v173_v3 = vpop.permute.xlu1 %172  ;;  %v1251_v60 = vld [vmem:[#allocation5 + $0x10] ss:$8 sps:$4 sm:$0xff]   ;;  %v1259_v61 = vld [vmem:[#allocation5 + $0x24] ss:$8 sps:$4 sm:$0xff]  }
  0xc9   :  { %v182_v7 = vmul.f32 %v1058_v42, %v173_v3  ;;  %v1269_v3 = vld [vmem:[#allocation5 + $0x40] ss:$8 sps:$4 sm:$0xff]  }
  0xca   :  { %v192_v8 = vmul.f32 0.70710677, %v184_v2  ;;  %v188_v29 = vmul.f32 0.5, %v184_v2  ;;  %v1271_v2 = vld [vmem:[#allocation5 + $0x44] ss:$8 sps:$4 sm:$0xff]  }
  0xcb   :  { %v186_v10 = vadd.f32 %v182_v7, %v157_v5  ;;  %v1275_v5 = vld [vmem:[#allocation5 + $0x50] ss:$8 sps:$4 sm:$0xff]  }
  0xcc   :  { %v161_v11 = vpop.permute.xlu1 %160  ;;  %1319 = verf.f32 %v192_v8  ;;  %v1280_v7 = vld [vmem:[#allocation5 + $0xd0] ss:$8 sps:$4 sm:$0xff]   ;;  %v1283_v8 = vld [vmem:[#allocation5 + $0x64] ss:$8 sps:$4 sm:$0xff]  }
  0xcd   :  { %v194_v14 = vmul.f32 0.70710677, %v186_v10  ;;  %v179_v15 = vmul.f32 %v1058_v42, %v161_v11  ;;  %v190_v23 = vmul.f32 0.5, %v186_v10  ;;  %824 = vmatpush1.bf16.msra.mxu1 %v1280_v7  ;;  %v1284_v10 = vld [vmem:[#allocation5 + $0xe4] ss:$8 sps:$4 sm:$0xff]   ;;  %v520_v7 = vshrl.u32 %v519_v6, 7 }
  0xce   :  { %v1286_v11 = vld [vmem:[#allocation5 + $0xe0] ss:$8 sps:$4 sm:$0xff]   ;;  %825 = vmatprep.subr.bf16.mxu1 %v1284_v10 }
  0xcf   :  { %1321 = verf.f32 %v194_v14  ;;  %v183_v16 = vadd.f32 %v179_v15, %v154_v13  ;;  %v1289_v13 = vld [vmem:[#allocation5 + $0x74] ss:$8 sps:$4 sm:$0xff]   ;;  %v1287_v14 = vld [vmem:[#allocation5 + $0x70] ss:$8 sps:$4 sm:$0xff]   ;;  %v525_v10 = vsub.s32 1, %v520_v7 }
  0xd0   :  { %v1318_v18 = vpop.eup %1317  ;;  %v1290_v15 = vld [vmem:[#allocation5 + $0xf4] ss:$8 sps:$4 sm:$0xff]  }
  0xd1   :  { %v191_v17 = vmul.f32 0.70710677, %v183_v16  ;;  %v201_v20 = vadd.f32 1.0, %v1318_v18  ;;  %v187_v31 = vmul.f32 0.5, %v183_v16  ;;  %826 = vmatpush1.bf16.msra.mxu1 %v1286_v11  ;;  %v1292_v16 = vld [vmem:[#allocation5 + $0xf0] ss:$8 sps:$4 sm:$0xff]  }
  0xd2   :  { %827 = vmatprep.subr.bf16.mxu1 %v1290_v15  ;;  %v1059_v18 = vld [vmem:[%s1548_s4] ss:$0 sm:$0xff] }
  0xd3   :  { %1323 = verf.f32 %v191_v17  ;;  %v205_v25 = vmul.f32 %v201_v20, %v189_v22  ;;  %v1295_v17 = vld [vmem:[#allocation5 + $0x104] ss:$8 sps:$4 sm:$0xff]  }
  0xd5   :  { %828 = vmatpush1.bf16.msra.mxu1 %v1292_v16 }
  0xd6   :  { %v1320_v19 = vpop.eup %1319  ;;  %973 = vmatprep.subr.bf16.mxu1 %v1295_v17 }
  0xd7   :  { %v200_v26 = vadd.f32 1.0, %v1320_v19 }
  0xd9   :  { %v1322_v21 = vpop.eup %1321  ;;  %v204_v33 = vmul.f32 %v200_v26, %v188_v29 }
  0xda   :  { %v202_v24 = vadd.f32 1.0, %v1322_v21 }
  0xdc   :  { %v206_v27 = vmul.f32 %v202_v24, %v190_v23 }
  0xdd   :  { %v1324_v28 = vpop.eup %1323 }
  0xde   :  { %v208_v30 = vpack.c.bf16 %v206_v27, %v205_v25  ;;  %v199_v32 = vadd.f32 1.0, %v1324_v28 }
  0xe0   :  { %v203_v34 = vmul.f32 %v199_v32, %v187_v31  ;;  %v319_v35 = vshrl.u32 %v208_v30, 16  ;;  %v322_v36 = vshll.u32 %v208_v30, 16  ;;  %v217_v38 = vrot.slane %v208_v30, 1 }
  0xe1   :  { %v421_v53 = vrot.slane %v208_v30, 2 }
  0xe2   :  { %v207_v37 = vpack.c.bf16 %v204_v33, %v203_v34  ;;  %v321_v42 = vrot.slane %v319_v35, 1  ;;  %v324_v43 = vrot.slane %v322_v36, 2 }
  0xe4   :  { %v221_v39 = vsel %vm218_vm0, %v207_v37, %v217_v38  ;;  %v314_v41 = vshll.u32 %v207_v37, 16  ;;  %v312_v44 = vshrl.u32 %v207_v37, 16  ;;  %v325_v47 = vor.u32 %v324_v43, %v321_v42 }
  0xe5   :  { %1152 = vmatprep.mubr.msk.bf16.mxu0 %vm254_vm1, %v221_v39  ;;  %v420_v52 = vrot.slane %v207_v37, 1 }
  0xe6   :  { %1153 = vmatmul.mubr.msk.bf16.vlgmr.msra.gmra.mrb[0].mxu0 %vm254_vm1, %v217_v38  ;;  %v316_v45 = vrot.slane %v314_v41, 1 }
  0xe7   :  { %1157 = vmatpush3.bf16.msra.mxu0 %v1489_v12  ;;  %v424_v12 = vsel %vm218_vm0, %v420_v52, %v421_v53  ;;  %v1304_v52 = vld [vmem:[#allocation5 + $0x134] ss:$8 sps:$4 sm:$0xff]  }
  0xe8   :  { %1158 = vmatprep.subr.bf16.mxu0 %v1238_v40  ;;  %v317_v46 = vor.u32 %v316_v45, %v312_v44  ;;  %v1293_v44 = vld [vmem:[#allocation5 + $0x100] ss:$8 sps:$4 sm:$0xff]  }
  0xea   :  { %v328_v49 = vsel %vm218_vm0, %v317_v46, %v325_v47 }
  0xeb   :  { %1159 = vmatpush3.bf16.msra.mxu0 %v1238_v40  ;;  %1164 = vmatprep.mubr.msk.bf16.mxu0 %vm254_vm1, %v328_v49  ;;  %v1296_v49 = vld [vmem:[#allocation5 + $0x110] ss:$8 sps:$4 sm:$0xff]  }
  0xec   :  { %1160 = vmatprep.subr.bf16.mxu0 %v1239_v48 }
  0xef   :  { %1161 = vmatpush3.bf16.msra.mxu0 %v1239_v48 }
  0xf0   :  { %1162 = vmatprep.subr.bf16.mxu0 %v1240_v50 }
  0xf3   :  { %1163 = vmatpush3.bf16.msra.mxu0 %v1240_v50  ;;  %v1301_v50 = vld [vmem:[#allocation5 + $0x124] ss:$8 sps:$4 sm:$0xff]  }
  0xf4   :  { %1168 = vmatprep.subr.bf16.mxu0 %v1241_v51 }
  0xf6   :  { %1165 = vmatmul.mubr.msk.bf16.vlgmr.msra.gmra.mrb[0].mxu0 %vm254_vm1, %v325_v47  ;;  %v1298_v47 = vld [vmem:[#allocation5 + $0x114] ss:$8 sps:$4 sm:$0xff]  }
  0xf7   :  { %1169 = vmatpush3.bf16.msra.mxu0 %v1241_v51  ;;  %1176 = vmatprep.mubr.msk.bf16.mxu0 %vm254_vm1, %v424_v12  ;;  %v1299_v51 = vld [vmem:[#allocation5 + $0x120] ss:$8 sps:$4 sm:$0xff]  }
  0xf8   :  { %1170 = vmatprep.subr.bf16.mxu0 %v1242_v54  ;;  %v1305_v12 = vld [vmem:[#allocation5 + $0x140] ss:$8 sps:$4 sm:$0xff]  }
  0xfb   :  { %1171 = vmatpush3.bf16.msra.mxu0 %v1242_v54  ;;  %v1307_v54 = vld [vmem:[#allocation5 + $0x144] ss:$8 sps:$4 sm:$0xff]  }
  0xfc   :  { %1172 = vmatprep.subr.bf16.mxu0 %v1243_v55 }
  0xff   :  { %1173 = vmatpush3.bf16.msra.mxu0 %v1243_v55  ;;  %v1310_v55 = vld [vmem:[#allocation5 + $0x154] ss:$8 sps:$4 sm:$0xff]  }
 0x100   :  { %1174 = vmatprep.subr.bf16.mxu0 %v1244_v56 }
 0x103   :  { %1175 = vmatpush3.bf16.msra.mxu0 %v1244_v56  ;;  %v1308_v56 = vld [vmem:[#allocation5 + $0x150] ss:$8 sps:$4 sm:$0xff]  }
 0x104   :  { %637 = vmatprep.subr.bf16.mxu0 %v1247_v57  ;;  %v1313_v57 = vld [vmem:[#allocation5 + $0x164] ss:$8 sps:$4 sm:$0xff]  }
 0x106   :  { %1177 = vmatmul.mubr.msk.bf16.vlgmr.msra.gmra.mrb[0].mxu0 %vm254_vm1, %v421_v53  ;;  %v1302_v53 = vld [vmem:[#allocation5 + $0x130] ss:$8 sps:$4 sm:$0xff]  }
 0x107   :  { %638 = vmatpush1.bf16.msra.mxu0 %v1245_v58  ;;  %669 = vmatprep.mubr.bf16.mxu0 %v1403_v0  ;;  %v1311_v58 = vld [vmem:[#allocation5 + $0x160] ss:$8 sps:$4 sm:$0xff]  }
 0x108   :  { %639 = vmatprep.subr.bf16.mxu0 %v1253_v59  ;;  %v1316_v59 = vld [vmem:[#allocation5 + $0x174] ss:$8 sps:$4 sm:$0xff]  }
 0x10b   :  { %640 = vmatpush1.bf16.msra.mxu0 %v1251_v60  ;;  %v1314_v60 = vld [vmem:[#allocation5 + $0x170] ss:$8 sps:$4 sm:$0xff]  }
 0x10c   :  { %641 = vmatprep.subr.bf16.mxu0 %v1259_v61 }
 0x10f   :  { %642 = vmatpush1.bf16.msra.mxu0 %v1257_v62 }
 0x110   :  { %643 = vmatprep.subr.bf16.mxu0 %v1265_v63 }
 0x113   :  { %644 = vmatpush1.bf16.msra.mxu0 %v1263_v1 }
 0x114   :  { %645 = vmatprep.subr.bf16.mxu0 %v1271_v2 }
 0x117   :  { %646 = vmatpush1.bf16.msra.mxu0 %v1269_v3 }
 0x118   :  { %647 = vmatprep.subr.bf16.mxu0 %v1277_v4 }
 0x11b   :  { %648 = vmatpush1.bf16.msra.mxu0 %v1275_v5 }
 0x11c   :  { %649 = vmatprep.subr.bf16.mxu0 %v1283_v8  ;;  %v521_v8 = vsub.s32 0, %v520_v7 }
 0x11f   :  { %650 = vmatpush1.bf16.msra.mxu0 %v1281_v9  ;;  %v517_v9 = vld [vmem:[%s1550_s6] sm:$0x3]  ;;  %s1407_s6 = smov [#allocation7]  }
 0x120   :  { %651 = vmatprep.subr.bf16.mxu0 %v1289_v13  ;;  %v522_v11 = vrot.slane %v517_v9, %v521_v8  ;;  %v526_v13 = vrot.slane %v517_v9, %v525_v10  ;;  %s1041_s22 = sshll.u32 %s1407_s6, 4  ;;  %s1042_s22 = int_to_ptr.vmem [resolvable:$true] %s1041_s22 }
 0x121   :  { %s1369_s23 = scalar_lea.vmem %s1042_s22, 768  ;;  %p1374_p3 = scmp.lt.s32.totalorder %s1042_s22, %s1042_s22 }
 0x122   :  { %p1370_p2 = scmp.ne.s32.totalorder %s1042_s22, %s1369_s23  ;;  %p1375_p4 = scmp.lt.s32.totalorder %s1369_s23, %s1369_s23 }
 0x123   :  { %652 = vmatpush1.bf16.msra.mxu0 %v1287_v14 }
 0x124   :  { %p1376_p5 = por %p1375_p4, %p1374_p3 }
 0x126   :  { %p1377_p6 = pnand %p1376_p5, %p1370_p2 }
 0x1d9   :  { %v1178_v19 = vpop.f32.mrb[0].mxu0 }
 0x1da   :  { %v496_v20 = vpop.f32.mrb[1].mxu0  ;;  %v1180_v22 = vadd.f32 %v1178_v19, %v1059_v18 }
 0x1db   :  { %v1179_v21 = vpop.f32.mrb[2].mxu0  ;;  %v1181_v25 = vadd.f32 %v1059_v18, %v496_v20 }
 0x1dc   :  { %v1182_v23 = vadd.f32 %v1179_v21, %v1059_v18  ;;  %v499_v24 = vpop.f32.mrb[3].mxu0 }
 0x1dd   :  { %v1183_v26 = vadd.f32 %v1059_v18, %v499_v24 }
 0x1de   :  { %v516_v27 = vpack.c.bf16 %v1182_v23, %v1180_v22 }
 0x1df   :  { %v515_v28 = vpack.c.bf16 %v1183_v26, %v1181_v25 }
 0x1e0   :  { %v703_v29 = vshrl.u32 %v516_v27, 16  ;;  %v706_v30 = vshll.u32 %v516_v27, 16  ;;  %v533_v31 = vrot.slane %v516_v27, 1  ;;  %v870_v32 = vrot.slane %v516_v27, 2 }
 0x1e1   :  { %v532_v33 = vrot.slane %v515_v28, 1  ;;  %v694_v34 = vshrl.u32 %v515_v28, 16  ;;  %v696_v35 = vshll.u32 %v515_v28, 16 }
 0x1e2   :  { %v705_v36 = vrot.slane %v703_v29, 1  ;;  %v708_v37 = vrot.slane %v706_v30, 2 }
 0x1e3   :  { %v534_v38 = vsel %vm218_vm0, %v532_v33, %v533_v31  ;;  %v698_v39 = vrot.slane %v696_v35, 1  ;;  %v701_v40 = vrot.slane %v694_v34, 1  ;;  %v874_v41 = vsel %vm536_vm2, %v532_v33, %v870_v32 }
 0x1e4   :  { %v539_v42 = vsel %vm536_vm2, %v515_v28, %v534_v38  ;;  %v709_v43 = vor.u32 %v708_v37, %v705_v36 }
 0x1e5   :  { %670 = vmatmul.mubr.bf16.vlgmr.msra.gmra.mrb[4].mxu0 %v539_v42  ;;  %v699_v45 = vor.u32 %v698_v39, %v694_v34 }
 0x1e6   :  { %v710_v46 = vsel %vm700_vm3, %v701_v40, %v709_v43  ;;  %679 = vmatprep.mubr.bf16.mxu0 %v1403_v0 }
 0x1e7   :  { %v714_v48 = vsel %vm536_vm2, %v699_v45, %v710_v46 }
 0x1e8   :  { %846 = vmatmul.mubr.bf16.vlgmr.msra.gmra.mrb[0].mxu1 %v714_v48 }
 0x1e9   :  { %974 = vmatpush1.bf16.msra.mxu1 %v1293_v44  ;;  %855 = vmatprep.mubr.bf16.mxu1 %v1403_v0 }
 0x1ea   :  { %975 = vmatprep.subr.bf16.mxu1 %v1298_v47 }
 0x1ed   :  { %976 = vmatpush1.bf16.msra.mxu1 %v1296_v49  ;;  %680 = vmatmul.mubr.bf16.gmra.mrb[8].mxu0 %v533_v31 }
 0x1ee   :  { %977 = vmatprep.subr.bf16.mxu1 %v1301_v50 }
 0x1f0   :  { %856 = vmatmul.mubr.bf16.gmra.mrb[4].mxu1 %v709_v43 }
 0x1f1   :  { %978 = vmatpush1.bf16.msra.mxu1 %v1299_v51  ;;  %1005 = vmatprep.mubr.bf16.mxu1 %v1403_v0 }
 0x1f2   :  { %979 = vmatprep.subr.bf16.mxu1 %v1304_v52 }
 0x1f5   :  { %980 = vmatpush1.bf16.msra.mxu1 %v1302_v53 }
 0x1f6   :  { %981 = vmatprep.subr.bf16.mxu1 %v1307_v54 }
 0x1f9   :  { %982 = vmatpush1.bf16.msra.mxu1 %v1305_v12 }
 0x1fa   :  { %983 = vmatprep.subr.bf16.mxu1 %v1310_v55 }
 0x1fd   :  { %984 = vmatpush1.bf16.msra.mxu1 %v1308_v56 }
 0x1fe   :  { %985 = vmatprep.subr.bf16.mxu1 %v1313_v57 }
 0x201   :  { %986 = vmatpush1.bf16.msra.mxu1 %v1311_v58 }
 0x202   :  { %987 = vmatprep.subr.bf16.mxu1 %v1316_v59 }
 0x205   :  { %988 = vmatpush1.bf16.msra.mxu1 %v1314_v60 }
 0x208   :  { %1006 = vmatmul.mubr.bf16.vlgmr.msra.gmra.mrb[0].mxu1 %v874_v41 }
 0x209   :  { %1015 = vmatprep.mubr.bf16.mxu1 %v1403_v0 }
 0x210   :  { %1016 = vmatmul.mubr.bf16.gmra.mrb[4].mxu1 %v870_v32 }
 0x2b8   :  { %v671_v61 = vpop.f32.mrb[4].mxu0 }
 0x2b9   :  { %v673_v62 = vpop.f32.mrb[5].mxu0  ;;  %v688_v0 = vadd.f32 %v671_v61, %v522_v11 }
 0x2ba   :  { %v675_v63 = vpop.f32.mrb[6].mxu0  ;;  %v689_v14 = vadd.f32 %v673_v62, %v526_v13 }
 0x2bb   :  { %v677_v1 = vpop.f32.mrb[7].mxu0  ;;  %v690_v16 = vadd.f32 %v675_v63, %v522_v11 }
 0x2bc   :  { %v691_v19 = vadd.f32 %v677_v1, %v526_v13 }
 0x2c0   :  { %v681_v2 = vpop.f32.mrb[8].mxu0 }
 0x2c1   :  { %v683_v3 = vpop.f32.mrb[9].mxu0  ;;  %v692_v25 = vadd.f32 %v681_v2, %v522_v11 }
 0x2c2   :  { %v685_v4 = vpop.f32.mrb[10].mxu0  ;;  %v693_v26 = vadd.f32 %v683_v3, %v526_v13 }
 0x2c3   :  { %v686_v5 = vpop.f32.mrb[11].mxu0 }
 0x2db   :  { %v1007_v15 = vpop.f32.mrb[0].mxu1 }
 0x2dc   :  { %v1185_v17 = vadd.f32 %v1007_v15, %v688_v0  ;;  %v1009_v18 = vpop.f32.mrb[1].mxu1 }
 0x2dd   :  { %v1187_v20 = vadd.f32 %v1009_v18, %v689_v14  ;;  %v1011_v21 = vpop.f32.mrb[2].mxu1 }
 0x2de   :  { %1030 = vst [vmem:[#allocation7] sm:$0xff] %v1185_v17  ;;  %v1189_v22 = vadd.f32 %v1011_v21, %v690_v16  ;;  %v1013_v23 = vpop.f32.mrb[3].mxu1 }
 0x2df   :  { %1031 = vst [vmem:[#allocation7 + $0x8] sm:$0xff] %v1187_v20  ;;  %v1191_v24 = vadd.f32 %v1013_v23, %v691_v19 }
 0x2e0   :  { %1032 = vst [vmem:[#allocation7 + $0x10] sm:$0xff] %v1189_v22 }
 0x2e1   :  { %1033 = vst [vmem:[#allocation7 + $0x18] sm:$0xff] %v1191_v24 }
 0x2e3   :  { %v1017_v27 = vpop.f32.mrb[4].mxu1 }
 0x2e4   :  { %v1193_v28 = vadd.f32 %v1017_v27, %v692_v25  ;;  %v1019_v29 = vpop.f32.mrb[5].mxu1 }
 0x2e5   :  { %v1195_v30 = vadd.f32 %v1019_v29, %v693_v26  ;;  %v1021_v31 = vpop.f32.mrb[6].mxu1 }
 0x2e6   :  { %1034 = vst [vmem:[#allocation7 + $0x20] sm:$0xff] %v1193_v28  ;;  %v1022_v32 = vpop.f32.mrb[7].mxu1 }
 0x2e7   :  { %1035 = vst [vmem:[#allocation7 + $0x28] sm:$0xff] %v1195_v30 }
 0x2e8   :  { %1380 = shalt.err (!%p1377_p6)
}
 0x2e9   :  { %s1381_s25 = scalar_lea.hbm %s1551_s7, 768 }
 0x2ea   :  { %p1382_p7 = scmp.ne.s32.totalorder %s1551_s7, %s1381_s25  ;;  %p1385_p8 = scmp.lt.u32.totalorder %s1381_s25, %s1551_s7 }
 0x2ec   :  { %p1387_p9 = pnand %p1385_p8, %p1382_p7 }
 0x2ee   :  { %1390 = shalt.err (!%p1387_p9)
}
 0x2ef   :  { %s1408_s30 = smov 256   ;;  %s1409_s8 = smov 16  }
 0x2f0   :  { %1047 = dma.vmem_to_hbm [thread:$0]  %s1042_s22, 768, %s1551_s7, [#allocation4], %s1408_s30, %s1408_s30, %s1409_s8  }
 0x2f1   :  { %1395 = dma.done.wait [#allocation4], 768  }
 0x2f2   :  { %1396 = vsyncadd [#allocation4], 4294966528 }
 0x2f3   :  { %1051 = vsyncpa [#allocation3], 1 }
 0x2f4   :  { %1052 = vsyncpa [#allocation6], 1 }
 0x2f5   :  { %1053 = vsyncpa [#allocation4], 1 }

</bundles_post_ra>
